<compile_context>
chip_gen: v5e
topology: v5e:2x2
jax: 0.10.0
libtpu: 0.0.40
codegen_flags: <defaults>
</compile_context>

<pallas_src>
import functools
import math

import jax
import jax.numpy as jnp
from jax import lax
from jax.experimental import pallas as pl
from jax.experimental.pallas import tpu as pltpu


_NEG_BIG = -1e30


def _round_up(x, m):
    return ((x + m - 1) // m) * m


def _cdiv(a, b):
    return -(-a // b)


def _vmem_capacity_bytes():
    # Generation-aware VMEM capacity; conservative (v7x = 64 MiB) fallback.
    try:
        cap = int(pltpu.get_tpu_info().vmem_capacity_bytes)
        if cap > 0:
            return cap
    except Exception:
        pass
    return 64 * 1024 * 1024


# ----------------------------- kernel bodies -----------------------------


def _single_chunk_kernel(*refs, masked):
    """n_thw == 1: the whole (padded) THW axis is one resident chunk."""
    if masked:
        mk_ref, q_ref, mv_ref, bias_ref, out_ref = refs
    else:
        mk_ref, q_ref, mv_ref, out_ref = refs
        bias_ref = None

    mk_blk = mk_ref[0]                      # (CK, THW_pad)  bf16
    q = q_ref[...]                          # (CK, hw_block) bf16, pre-scaled
    # Affinity (THW_pad, hw_block): contract CK (dim 0 of both) on the MXU
    # with f32 accumulation.  mk is never transposed in HBM.
    aff = lax.dot_general(mk_blk, q, (((0,), (0,)), ((), ())),
                          preferred_element_type=jnp.float32)
    if masked:
        aff = aff + bias_ref[...]           # (THW_pad, 1): 0 real / -1e30 pad

    m = jnp.max(aff, axis=0, keepdims=True)
    e = jnp.exp(aff - m)                    # f32
    l = jnp.sum(e, axis=0, keepdims=True)

    mv_blk = mv_ref[0]                      # (CV, THW_pad) bf16
    acc = jnp.dot(mv_blk, e.astype(mv_blk.dtype),
                  preferred_element_type=jnp.float32)
    inv_l = pl.reciprocal(l, approx=False)
    out_ref[0] = (acc * inv_l).astype(out_ref.dtype)


def _online_softmax_kernel(*refs, masked):
    """n_thw > 1: flash-style online softmax over THW chunks (innermost axis).

    mk/mv index maps do not depend on the HW axis, so the memory tensors are
    streamed from HBM exactly once per (batch, HW super-tile); the softmax
    state (m, l) and the (CV, hw_block) accumulator stay in VMEM scratch.
    """
    if masked:
        mk_ref, q_ref, mv_ref, bias_ref, out_ref, m_sc, l_sc, acc_sc = refs
    else:
        mk_ref, q_ref, mv_ref, out_ref, m_sc, l_sc, acc_sc = refs
        bias_ref = None

    t = pl.program_id(2)

    @pl.when(t == 0)
    def _():
        m_sc[...] = jnp.full_like(m_sc, -jnp.inf)
        l_sc[...] = jnp.zeros_like(l_sc)
        acc_sc[...] = jnp.zeros_like(acc_sc)

    mk_blk = mk_ref[0]                      # (CK, thw_tile)  bf16
    q = q_ref[...]                          # (CK, hw_block)  bf16
    aff = lax.dot_general(mk_blk, q, (((0,), (0,)), ((), ())),
                          preferred_element_type=jnp.float32)
    if masked:
        # Additive bias is all-zero except on the last chunk (padded rows).
        aff = aff + bias_ref[...]

    m_prev = m_sc[...]
    m_new = jnp.maximum(m_prev, jnp.max(aff, axis=0, keepdims=True))
    alpha = jnp.exp(m_prev - m_new)
    e = jnp.exp(aff - m_new)                # f32
    l_sc[...] = alpha * l_sc[...] + jnp.sum(e, axis=0, keepdims=True)

    mv_blk = mv_ref[0]                      # (CV, thw_tile) bf16
    acc_sc[...] = alpha * acc_sc[...] + jnp.dot(
        mv_blk, e.astype(mv_blk.dtype), preferred_element_type=jnp.float32)
    m_sc[...] = m_new

    @pl.when(t == pl.num_programs(2) - 1)
    def _():
        inv_l = pl.reciprocal(l_sc[...], approx=False)
        out_ref[0] = (acc_sc[...] * inv_l).astype(out_ref.dtype)


# ----------------------------- tile selection -----------------------------


def _choose_tiles(B, CK, CV, THW, HW, compute_dtype, out_dtype,
                  hw_block=None, thw_tile=None):
    cd_b = jnp.dtype(compute_dtype).itemsize
    out_b = jnp.dtype(out_dtype).itemsize
    vmem_cap = _vmem_capacity_bytes()
    budget = int(vmem_cap * 0.55)           # ~35 MiB on v7x, ~70 MiB on v5e/v6e

    hw_full = _round_up(HW, 128)
    if hw_block is None:
        if B == 1 and hw_full > 128:
            # 2 HW super-tiles so a >=2-wide "parallel" axis exists (v7x has
            # 2 TensorCores and eval typically runs B == 1).
            hw_block = _round_up(_cdiv(HW, 2), 128)
        else:
            hw_block = hw_full
        hw_block = min(hw_block, 2048, hw_full)
    hw_block = max(128, _round_up(hw_block, 128))
    n_super = _cdiv(HW, hw_block)
    HW_pad = n_super * hw_block

    thw_full = _round_up(THW, 128)
    # THW-independent VMEM: double-buffered q & out tiles + softmax scratch.
    fixed = (2 * CK * hw_block * cd_b
             + 2 * CV * hw_block * out_b
             + (2 + CV) * hw_block * 4)

    # Per-chunk VMEM: double-buffered bf16 mk/mv chunks, f32 affinity + exp
    # temporaries, and the bf16 copy of e fed to the value matmul.
    def per_thw(t):
        return (2 * (CK + CV) * t * cd_b
                + 2 * t * hw_block * 4
                + t * hw_block * cd_b)

    if thw_tile is None:
        avail = max(budget - fixed, 4 * 1024 * 1024)
        thw_tile = 128
        for mult in range(1, thw_full // 128 + 1):
            t = mult * 128
            if per_thw(t) <= avail:
                thw_tile = t
        thw_tile = min(thw_tile, thw_full)
    thw_tile = max(128, _round_up(thw_tile, 128))
    thw_tile = min(thw_tile, thw_full)
    n_thw = _cdiv(THW, thw_tile)
    THW_pad = n_thw * thw_tile

    vmem_est = fixed + per_thw(thw_tile)
    vmem_limit = int(max(vmem_est * 5 // 4, 32 * 1024 * 1024))
    vmem_limit = int(min(vmem_limit, vmem_cap - 4 * 1024 * 1024))
    vmem_limit = int(max(vmem_limit, 16 * 1024 * 1024))

    return hw_block, n_super, HW_pad, thw_tile, n_thw, THW_pad, vmem_limit


# ----------------------------- public wrapper -----------------------------


def eval_memory_reader(mk, mv, qk, top_k=None, km=None, *,
                       compute_dtype=jnp.bfloat16,
                       hw_block=None, thw_tile=None):
    """Pallas TPU EvalMemoryReader.forward (top_k=None, km=None path)."""
    # TODO(synk): the top_k / km branches (gaussian-modulated top-k softmax
    # with scatter back into the affinity) need a top-k + scatter along THW
    # with no clean Pallas TPU equivalent here; only the plain-softmax path
    # is implemented in-kernel.
    if top_k is not None or km is not None:
        raise NotImplementedError("only top_k=None, km=None is implemented")

    B, CK, T, H, W = mk.shape
    _, CV, _, _, _ = mv.shape
    THW, HW = T * H * W, H * W
    out_dtype = mv.dtype

    (hw_block, n_super, HW_pad, thw_tile, n_thw, THW_pad,
     vmem_limit) = _choose_tiles(B, CK, CV, THW, HW, compute_dtype, out_dtype,
                                 hw_block, thw_tile)

    # Keep mk/mv as (B, C, THW): no host-side transpose of the big tensors.
    mk3 = mk.reshape(B, CK, THW)
    mv3 = mv.reshape(B, CV, THW)
    q2 = qk.reshape(CK, HW) * (1.0 / math.sqrt(CK))

    if THW_pad != THW:
        mk3 = jnp.pad(mk3, ((0, 0), (0, 0), (0, THW_pad - THW)))
        mv3 = jnp.pad(mv3, ((0, 0), (0, 0), (0, THW_pad - THW)))
    if HW_pad != HW:
        q2 = jnp.pad(q2, ((0, 0), (0, HW_pad - HW)))

    mk3 = mk3.astype(compute_dtype)
    mv3 = mv3.astype(compute_dtype)
    q2 = q2.astype(compute_dtype)

    masked = THW_pad != THW
    inputs = [mk3, q2, mv3]
    in_specs = [
        # mk / mv: chunked along THW, independent of the HW axis -> streamed
        # from HBM exactly once per (batch, HW super-tile).
        pl.BlockSpec((1, CK, thw_tile), lambda b, s, t: (b, 0, t)),
        pl.BlockSpec((CK, hw_block), lambda b, s, t: (0, s)),
        pl.BlockSpec((1, CV, thw_tile), lambda b, s, t: (b, 0, t)),
    ]
    if masked:
        # Additive logit bias: 0 for real memory rows, -1e30 for padded rows.
        bias = jnp.where(jnp.arange(THW_pad) < THW, 0.0, _NEG_BIG)
        bias = bias.astype(jnp.float32).reshape(THW_pad, 1)
        inputs.append(bias)
        in_specs.append(pl.BlockSpec((thw_tile, 1), lambda b, s, t: (t, 0)))

    if n_thw == 1:
        kernel = functools.partial(_single_chunk_kernel, masked=masked)
        scratch_shapes = []
    else:
        # Padding (< thw_tile rows) can never cover a full chunk, so every
        # chunk has at least one real row and the -1e30 mask is safe.
        assert THW_pad - THW < thw_tile
        kernel = functools.partial(_online_softmax_kernel, masked=masked)
        scratch_shapes = [
            pltpu.VMEM((1, hw_block), jnp.float32),    # running max m
            pltpu.VMEM((1, hw_block), jnp.float32),    # running denom l
            pltpu.VMEM((CV, hw_block), jnp.float32),   # output accumulator
        ]

    out = pl.pallas_call(
        kernel,
        out_shape=jax.ShapeDtypeStruct((B, CV, HW_pad), out_dtype),
        grid_spec=pltpu.PrefetchScalarGridSpec(
            num_scalar_prefetch=0,
            grid=(B, n_super, n_thw),
            in_specs=in_specs,
            out_specs=pl.BlockSpec((1, CV, hw_block),
                                   lambda b, s, t: (b, 0, s)),
            scratch_shapes=scratch_shapes,
        ),
        compiler_params=pltpu.CompilerParams(
            dimension_semantics=("parallel", "parallel", "arbitrary"),
            vmem_limit_bytes=vmem_limit,
        ),
    )(*inputs)

    return out[:, :, :HW].reshape(B, CV, H, W)


# ----------------------------- reference + tests -----------------------------


def _reference(mk, mv, qk):
    """Pure-JAX f32 reference mirroring the torch code (top_k=None, km=None)."""
    B, CK, T, H, W = mk.shape
    _, CV, _, _, _ = mv.shape
    THW, HW = T * H * W, H * W
    mi = jnp.transpose(mk.reshape(B, CK, THW), (0, 2, 1))
    qi = jnp.broadcast_to(qk.reshape(1, CK, HW), (B, CK, HW)) / math.sqrt(CK)
    affinity = jnp.einsum("bmc,bcq->bmq", mi, qi)
    affinity = jax.nn.softmax(affinity, axis=1)
    mo = mv.reshape(B, CV, THW)
    mem = jnp.einsum("bcm,bmq->bcq", mo, affinity)
    return mem.reshape(B, CV, H, W)


if __name__ == "__main__":
    ks = jax.random.split(jax.random.PRNGKey(0), 9)

    def _check(name, out, ref, atol=3e-2):
        err = float(jnp.max(jnp.abs(out - ref)))
        assert jnp.allclose(out, ref, atol=atol, rtol=atol), (
            "%s mismatch vs reference: max abs err = %g" % (name, err))

    # Test 1: lane-aligned shapes (HW=128, THW=256), B=2 -> single THW chunk,
    # single HW super-tile, single-chunk specialized kernel.
    B, CK, CV, T, H, W = 2, 32, 32, 2, 8, 16
    mk = jax.random.normal(ks[0], (B, CK, T, H, W), dtype=jnp.float32)
    mv = jax.random.normal(ks[1], (B, CV, T, H, W), dtype=jnp.float32)
    qk = jax.random.normal(ks[2], (1, CK, H, W), dtype=jnp.float32)
    out = jax.block_until_ready(eval_memory_reader(mk, mv, qk))
    assert out.shape == (B, CV, H, W)
    _check("test1", out, jax.block_until_ready(_reference(mk, mv, qk)))

    # Test 2: non-lane-aligned shapes (THW=180, HW=60) with forced THW
    # chunking -> exercises padding mask + online-softmax reduction.
    B, CK, CV, T, H, W = 2, 32, 16, 3, 6, 10
    mk = jax.random.normal(ks[3], (B, CK, T, H, W), dtype=jnp.float32)
    mv = jax.random.normal(ks[4], (B, CV, T, H, W), dtype=jnp.float32)
    qk = jax.random.normal(ks[5], (1, CK, H, W), dtype=jnp.float32)
    out = jax.block_until_ready(eval_memory_reader(mk, mv, qk, thw_tile=128))
    assert out.shape == (B, CV, H, W)
    _check("test2", out, jax.block_until_ready(_reference(mk, mv, qk)))

    # Test 3: B=1 (two parallel HW super-tiles), HW=320 padded to 2x256,
    # THW=640 chunked into 3x256 (padded) -> exercises the full restructured
    # grid: super-tiles + online softmax + padded query columns.
    B, CK, CV, T, H, W = 1, 32, 32, 2, 16, 20
    mk = jax.random.normal(ks[6], (B, CK, T, H, W), dtype=jnp.float32)
    mv = jax.random.normal(ks[7], (B, CV, T, H, W), dtype=jnp.float32)
    qk = jax.random.normal(ks[8], (1, CK, H, W), dtype=jnp.float32)
    out = jax.block_until_ready(eval_memory_reader(mk, mv, qk, thw_tile=256))
    assert out.shape == (B, CV, H, W)
    _check("test3", out, jax.block_until_ready(_reference(mk, mv, qk)))

    print("KERNEL_OK")
</pallas_src>

<mosaic_0001>
module attributes {stable_mosaic.version = 11 : i64} {
  func.func @_single_chunk_kernel(%arg0: i32, %arg1: i32, %arg2: i32, %arg3: memref<1x32x256xbf16, #tpu.memory_space<vmem>>, %arg4: memref<32x128xbf16, #tpu.memory_space<vmem>>, %arg5: memref<1x32x256xbf16, #tpu.memory_space<vmem>>, %arg6: memref<1x32x128xf32, #tpu.memory_space<vmem>>) attributes {dimension_semantics = [#tpu.dimension_semantics<parallel>, #tpu.dimension_semantics<parallel>, #tpu.dimension_semantics<arbitrary>], iteration_bounds = array<i64: 2, 1, 1>, scalar_prefetch = 0 : i64, scratch_operands = 0 : i64, tpu.core_type = #tpu.core_type<tc>, window_params = [{transform_indices = @transform_0, window_bounds = array<i64: 1, 32, 256>}, {transform_indices = @transform_1, window_bounds = array<i64: 32, 128>}, {transform_indices = @transform_2, window_bounds = array<i64: 1, 32, 256>}, {transform_indices = @transform_3, window_bounds = array<i64: 1, 32, 128>}]} {
    %c0 = arith.constant 0 : index
    %c0_0 = arith.constant 0 : index
    %c0_1 = arith.constant 0 : index
    %0 = vector.load %arg3[%c0, %c0_0, %c0_1] : memref<1x32x256xbf16, #tpu.memory_space<vmem>>, vector<1x32x256xbf16>
    %1 = vector.shape_cast %0 : vector<1x32x256xbf16> to vector<32x256xbf16>
    %c0_2 = arith.constant 0 : index
    %c0_3 = arith.constant 0 : index
    %2 = vector.load %arg4[%c0_2, %c0_3] : memref<32x128xbf16, #tpu.memory_space<vmem>>, vector<32x128xbf16>
    %cst = arith.constant dense<0.000000e+00> : vector<256x128xf32>
    %3 = tpu.matmul %1, %2, %cst {dimension_numbers = #tpu.dot_dimension_numbers<[0], [0], [1], [1], [0, 1, 1, 1], [], []>} : vector<32x256xbf16>, vector<32x128xbf16>, vector<256x128xf32> -> vector<256x128xf32>
    %cst_4 = arith.constant dense<0xFF800000> : vector<128xf32>
    %4 = vector.multi_reduction <maximumf>, %3, %cst_4 [0] : vector<256x128xf32> to vector<128xf32>
    %5 = vector.shape_cast %4 : vector<128xf32> to vector<1x128xf32>
    %6 = vector.broadcast %5 : vector<1x128xf32> to vector<256x128xf32>
    %7 = arith.subf %3, %6 : vector<256x128xf32>
    %8 = math.exp %7 : vector<256x128xf32>
    %cst_5 = arith.constant dense<0.000000e+00> : vector<128xf32>
    %9 = vector.multi_reduction <add>, %8, %cst_5 [0] : vector<256x128xf32> to vector<128xf32>
    %10 = vector.shape_cast %9 : vector<128xf32> to vector<1x128xf32>
    %c0_6 = arith.constant 0 : index
    %c0_7 = arith.constant 0 : index
    %c0_8 = arith.constant 0 : index
    %11 = vector.load %arg5[%c0_6, %c0_7, %c0_8] : memref<1x32x256xbf16, #tpu.memory_space<vmem>>, vector<1x32x256xbf16>
    %12 = vector.shape_cast %11 : vector<1x32x256xbf16> to vector<32x256xbf16>
    %13 = arith.truncf %8 : vector<256x128xf32> to vector<256x128xbf16>
    %cst_9 = arith.constant dense<0.000000e+00> : vector<32x128xf32>
    %14 = tpu.matmul %12, %13, %cst_9 {dimension_numbers = #tpu.dot_dimension_numbers<[1], [0], [0], [1], [0, 0, 1, 1], [], []>} : vector<32x256xbf16>, vector<256x128xbf16>, vector<32x128xf32> -> vector<32x128xf32>
    %15 = tpu.reciprocal %10 : vector<1x128xf32> -> vector<1x128xf32>
    %16 = vector.broadcast %15 : vector<1x128xf32> to vector<32x128xf32>
    %17 = arith.mulf %14, %16 : vector<32x128xf32>
    %c0_10 = arith.constant 0 : index
    %c0_11 = arith.constant 0 : index
    %c0_12 = arith.constant 0 : index
    %18 = vector.load %arg6[%c0_10, %c0_11, %c0_12] : memref<1x32x128xf32, #tpu.memory_space<vmem>>, vector<1x32x128xf32>
    %19 = vector.shape_cast %18 : vector<1x32x128xf32> to vector<32x128xf32>
    %20 = vector.shape_cast %17 : vector<32x128xf32> to vector<1x32x128xf32>
    tpu.vector_store %arg6[%c0_10, %c0_11, %c0_12], %20 {strides = array<i32>} : memref<1x32x128xf32, #tpu.memory_space<vmem>>, vector<1x32x128xf32>,
    return
  }
  func.func @transform_0(%arg0: i32, %arg1: i32, %arg2: i32) -> (i32, i32, i32) {
    %c0_i32 = arith.constant 0 : i32
    %c0_i32_0 = arith.constant 0 : i32
    return %arg0, %c0_i32, %arg2 : i32, i32, i32
  }
  func.func @transform_1(%arg0: i32, %arg1: i32, %arg2: i32) -> (i32, i32) {
    %c0_i32 = arith.constant 0 : i32
    %c0_i32_0 = arith.constant 0 : i32
    return %c0_i32, %arg1 : i32, i32
  }
  func.func @transform_2(%arg0: i32, %arg1: i32, %arg2: i32) -> (i32, i32, i32) {
    %c0_i32 = arith.constant 0 : i32
    %c0_i32_0 = arith.constant 0 : i32
    return %arg0, %c0_i32, %arg2 : i32, i32, i32
  }
  func.func @transform_3(%arg0: i32, %arg1: i32, %arg2: i32) -> (i32, i32, i32) {
    %c0_i32 = arith.constant 0 : i32
    %c0_i32_0 = arith.constant 0 : i32
    return %arg0, %c0_i32, %arg1 : i32, i32, i32
  }
}

</mosaic_0001>

<bundles_post_ra>
// kernel: tpu_custom_call.1
= control target key start
LH: loop header
LB: loop body
LE: loop exit
PB: predicated region body
PF: predicated region fallthrough
CT: control target
= control target key end

     0   :  { %8 = vsyncpa [#allocation3], 0  ;;  %s1771_s0 = inlined_call_operand.hbm [shape: bf16[2,32,256], index: 0, kind: input, shape index: {}]   ;;  %s1772_s1 = inlined_call_operand.hbm [shape: bf16[32,128], index: 1, kind: input, shape index: {}]   ;;  %s1773_s2 = inlined_call_operand.hbm [shape: bf16[2,32,256], index: 2, kind: input, shape index: {}]   ;;  %s1774_s3 = inlined_call_operand.hbm [shape: f32[2,32,128], index: 3, kind: output, shape index: {}]  }
   0x1   :  { %10 = vsyncpa [#allocation3 + $0x1], 0 }
   0x2   :  { %11 = vsyncpa [#allocation6], 0 }
   0x3   :  { %12 = vsyncpa [#allocation4], 0 }
   0x4   :  { %14 = vsyncpa [#allocation4 + $0x1], 0  ;;  %s1350_s12 = smov 0   ;;  %s1352_s13 = smov 0  }
   0x5   :  { %s1354_s14 = smov 0   ;;  %s1356_s15 = smov 0  }
   0x6   :  { %s1358_s16 = smov 0   ;;  %s1360_s17 = smov 0  }
   0x7 LB: > { %s39_s18 = sadd.s32 1, %s1317_s16  ;;  %s48_s19 = sadd.s32 1, %s1309_s14  ;;  %s1321_s17 = sphi %s1360_s17, %s20_s17   ;;  %s1317_s16 = sphi %s1358_s16, %s1784_s16   ;;  %s1313_s15 = sphi %s1356_s15, %s1783_s15   ;;  %s1309_s14 = sphi %s1354_s14, %s1782_s14   ;;  %s1305_s13 = sphi %s1352_s13, %s1781_s13   ;;  %s1301_s12 = sphi %s1350_s12, %s1780_s12  }
   0x8   : > { %p41_p0 = scmp.ge.s32.totalorder %s39_s18, 2  ;;  %p55_p1 = scmp.ne.s32.totalorder %s1309_s14, %s1305_s13 }
   0x9   : > { %p56_p2 = scmp.eq.s32.totalorder %s1321_s17, 0  ;;  %p900_p3 = scmp.ge.s32.totalorder %s1321_s17, 2 }
   0xa   : > { %s1786_s18 = smov (%p41_p0, %s39_s18), 0  ;;  %p1016_p5 = scmp.lt.s32.totalorder %s1321_s17, 2 }
   0xb   : > { %p1391_p4 = por %p56_p2, %p55_p1  ;;  %s43_s21 = ssub.s32 %s1317_s16, %s1786_s18 }
   0xc   : > { %s183_s22 = sand.u32 1, %s1321_s17   ;;  %p46_p6 = scmp.eq.s32.totalorder %s43_s21, 0 }
   0xd   : > { %s185_s23 = sand.u32 1, %s1309_s14   ;;  %s973_s24 = sshll.u32 %s1317_s16, 5 }
   0xe   : > { %s1402_s25 = scalar_select %p46_p6, %s1309_s14, %s48_s19  }
   0xf   : > { %s901_s26 = sshll.u32 %s185_s23, 5  ;;  %s194_s29 = scalar_lea.hbm %s1771_s0, %s973_s24 }
  0x10   : > { %s195_s30 = sshll.u32 %s194_s29, 4  ;;  %s187_s4 = scalar_lea.vmem [#allocation2], %s901_s26  ;;  %s196_s30 = int_to_ptr.hbm [resolvable:$true] %s195_s30 }
  0x11   : > { %s197_s5 = sshll.u32 %s187_s4, 4  ;;  %p1411_p7 = pnand %p1016_p5, %p1391_p4  ;;  %s198_s5 = int_to_ptr.vmem [resolvable:$true] %s197_s5 }
  0x12   : > { %s1415_s7 = scalar_lea.sflag [#allocation3], %s183_s22  ;;  %s1323_s8 = smov 128  }
  0x13   : > { %s1324_s9 = smov 8   ;;  %s218_s19 = scalar_lea.hbm %s1773_s2, %s973_s24 }
  0x14   : > { %1007 = dma.hbm_to_vmem [thread:$0]  (!%p1411_p7), %s196_s30, 512, %s198_s5, %s1415_s7, %s1323_s8, %s1323_s8, %s1324_s9  }
  0x15   : > { %s211_s20 = scalar_lea.vmem [#allocation7], %s901_s26  ;;  %s219_s23 = sshll.u32 %s218_s19, 4  ;;  %s220_s23 = int_to_ptr.hbm [resolvable:$true] %s219_s23 }
  0x16   : > { %s221_s21 = sshll.u32 %s211_s20, 4  ;;  %s1427_s22 = sadd.s32 4294967295, %s1321_s17   ;;  %s222_s21 = int_to_ptr.vmem [resolvable:$true] %s221_s21 }
  0x17   : > { %s897_s27 = sadd.s32 4294967294, %s1321_s17   ;;  %p61_p8 = scmp.ne.s32.totalorder %s1305_s13, %s1301_s12 }
  0x18   : > { %p62_p9 = scmp.eq.s32.totalorder %s1427_s22, 0  ;;  %p141_p10 = scmp.eq.s32.totalorder %s1427_s22, 1 }
  0x19   : > { %p147_p11 = scmp.eq.s32.totalorder %s897_s27, 1  ;;  %p898_p12 = scmp.ge.s32.totalorder %s1321_s17, 1 }
  0x1a   : > { %p1437_p13 = por %p62_p9, %p61_p8  ;;  %p1444_p0 = por %p141_p10, %p55_p1 }
  0x1b   : > { %p1448_p2 = por %p147_p11, %p61_p8  ;;  %p154_p4 = scmp.lt.s32.totalorder %s1321_s17, 3 }
  0x1c   : > { %s167_s4 = sshll.u32 %s1772_s1, 4  ;;  %s1325_s5 = smov [#allocation5]   ;;  %s168_s4 = int_to_ptr.hbm [resolvable:$true] %s167_s4 }
  0x1d   : > { %p155_p5 = pnand %p898_p12, %p154_p4  ;;  %s169_s10 = sshll.u32 %s1325_s5, 4  ;;  %s170_s10 = int_to_ptr.vmem [resolvable:$true] %s169_s10 }
  0x1e   : > { %1010 = dma.hbm_to_vmem [thread:$0]  (!%p1411_p7), %s220_s23, 512, %s222_s21, %s1415_s7, %s1323_s8, %s1323_s8, %s1324_s9  }
  0x1f   : > { %p1000_p6 = pneg %p155_p5  ;;  %s1326_s11 = smov 64  }
  0x20   : > { %s1327_s19 = smov 4   ;;  %233 = sbr.rel (%p155_p5) target bundleno = 753 (0x2f1), region = 32 }
  0x21   : > { %p1001_p1 = pnand %p1000_p6, %p62_p9  ;;  %s235_s20 = sand.u32 (!%p155_p5), 1, %s1427_s22  }
  0x22   : > { %s237_s27 = sand.u32 (!%p155_p5), 1, %s1305_s13   ;;  %s236_s30 = scalar_lea.sflag (!%p155_p5), [#allocation3], %s235_s20 }
  0x23   : > { %1003 = dma.hbm_to_vmem [thread:$0]  (!%p1001_p1), %s168_s4, 256, %s170_s10, [#allocation6], %s1326_s11, %s1326_s11, %s1327_s19  }
  0x24   : > { %s1468_s29 = sshll.u32 (!%p155_p5), %s237_s27, 5 }
  0x25   : > { %s239_s6 = scalar_lea.vmem [#allocation2], %s1468_s29 }
  0x26   : > { %1284 = dma.done.wait (%p1437_p13), %s236_s30, 512  }
  0x27   : > { %1286 = vsyncadd (%p1437_p13), %s236_s30, 4294966784 }
  0x28   : > { %1288 = dma.done.wait (%p62_p9), [#allocation6], 256  }
  0x29   : > { %1290 = vsyncadd (%p62_p9), [#allocation6], 4294967040  ;;  %s1480_s7 = scalar_lea.vmem [#allocation7], %s1468_s29 }
  0x2a   : > { %1292 = dma.done.wait (%p1437_p13), %s236_s30, 512  }
  0x2b   : > { %1294 = vsyncadd (%p1437_p13), %s236_s30, 4294966784  ;;  %v975_v0 = vld [vmem:[%s239_s6 + $0x4] sm:$0xf]  ;;  %v914_v1 = vld [vmem:[%s239_s6] sm:$0xf]  ;;  %vm350_vm0 = vcmask 261120  }
  0x2c   : > { %v916_v2 = vld [vmem:[%s239_s6 + $0x8] sm:$0xf0]  ;;  %v976_v3 = vld [vmem:[%s239_s6 + $0x4] sm:$0xf0]  ;;  %v979_v7 = vld [vmem:[#allocation5] sm:$0xff]  ;;  %s282_s8 = scalar_lea.vmem [#allocation8], %s1468_s29 }
  0x2d   : > { %v919_v4 = vor.u32 %v975_v0, %v916_v2  ;;  %v915_v5 = vor.u32 %v976_v3, %v914_v1  ;;  %v980_v6 = vld [vmem:[#allocation5 + $0x8] sm:$0xff]  ;;  %v977_v8 = vld [vmem:[%s239_s6 + $0x14] sm:$0xf]  ;;  %v922_v9 = vld [vmem:[%s239_s6 + $0x10] sm:$0xf]  ;;  %s985_s9 = sshll.u32 %s1313_s15, 5 }
  0x2e   : > { %405 = vmatpush.bf16.msra.mxu0 %v980_v6  ;;  %987 = vmatpush.bf16.msra.mxu3 %v980_v6  ;;  %v924_v10 = vld [vmem:[%s239_s6 + $0x18] sm:$0xf0]  ;;  %v978_v11 = vld [vmem:[%s239_s6 + $0x14] sm:$0xf0]  ;;  %s771_s22 = scalar_lea.hbm %s1774_s3, %s985_s9  ;;  %s772_s24 = sshll.u32 %s282_s8, 4  ;;  %s773_s24 = int_to_ptr.vmem [resolvable:$true] %s772_s24 }
  0x2f   : > { %314 = vxpose.binary.xlu0.c.b16.start [1/4] (short) %v919_v4, %v915_v5, 128  ;;  %v923_v12 = vor.u32 %v978_v11, %v922_v9  ;;  %v927_v13 = vor.u32 %v977_v8, %v924_v10  ;;  %s774_s4 = sshll.u32 %s771_s22, 4  ;;  %s759_s5 = scalar_lea.sflag [#allocation4], %s237_s27  ;;  %s775_s4 = int_to_ptr.hbm [resolvable:$true] %s774_s4 }
  0x30   : > { %986 = vmatpush.bf16.msra.mxu1 %v980_v6  ;;  %s1245_s10 = sshra.s32 %s775_s4, 4  ;;  %s1251_s20 = scalar_lea.hbm %s1774_s3, 64  ;;  %s1246_s10 = int_to_ptr.hbm [resolvable:$true] %s1245_s10 }
  0x31   : > { %s1247_s15 = scalar_lea.hbm %s1246_s10, 32  ;;  %p1252_p10 = scmp.lt.s32.totalorder %s1246_s10, %s1774_s3 }
  0x32   : > { %406 = vmatpush.bf16.msra.mxu0 %v979_v7  ;;  %989 = vmatpush.bf16.msra.mxu3 %v979_v7  ;;  %p1248_p7 = scmp.ne.s32.totalorder %s1246_s10, %s1247_s15  ;;  %p1253_p11 = scmp.lt.s32.totalorder %s1251_s20, %s1247_s15 }
  0x34   : > { %988 = vmatpush.bf16.msra.mxu1 %v979_v7  ;;  %p1249_p8 = pnand %p1248_p7, %p1444_p0  ;;  %p1254_p12 = por %p1253_p11, %p1252_p10 }
  0x36   : > { %p1250_p9 = pneg %p1249_p8 }
  0x38   : > { %p1255_p13 = pnand %p1254_p12, %p1250_p9 }
  0x3f   : > { %315 = vxpose.binary.xlu0.c.b16.end [2/4] (short) %v927_v13, %v923_v12, 128 }
  0xdb   : > { %v322_v14 = vpop.trf.xlu0 }
  0xdc   : > { %936 = vmatmul.msk.bf16.vlgmr.msra.gmra.mxu0 %vm350_vm0, %v322_v14 }
  0xe3   : > { %v323_v15 = vpop.trf.xlu0 }
  0xeb   : > { %v324_v16 = vpop.trf.xlu0 }
  0xec   : > { %937 = vmatmul.msk.bf16.gmra.mxu0 %vm350_vm0, %v324_v16 }
  0xf3   : > { %v325_v17 = vpop.trf.xlu0 }
  0xfb   : > { %v326_v18 = vpop.trf.xlu0 }
  0xfc   : > { %938 = vmatmul.msk.bf16.gmra.mxu0 %vm350_vm0, %v326_v18 }
 0x103   : > { %v327_v19 = vpop.trf.xlu0 }
 0x104   : > { %946 = vmatmul.msk.bf16.vlgmr.msra.gmra.mxu3 %vm350_vm0, %v327_v19 }
 0x10b   : > { %v328_v20 = vpop.trf.xlu0 }
 0x10c   : > { %939 = vmatmul.msk.bf16.gmra.mxu0 %vm350_vm0, %v328_v20 }
 0x113   : > { %v329_v21 = vpop.trf.xlu0 }
 0x114   : > { %947 = vmatmul.msk.bf16.gmra.mxu3 %vm350_vm0, %v329_v21 }
 0x11b   : > { %v330_v22 = vpop.trf.xlu0 }
 0x11c   : > { %940 = vmatmul.msk.bf16.gmra.mxu0 %vm350_vm0, %v330_v22 }
 0x123   : > { %v331_v23 = vpop.trf.xlu0 }
 0x124   : > { %948 = vmatmul.msk.bf16.gmra.mxu3 %vm350_vm0, %v331_v23 }
 0x12b   : > { %v332_v24 = vpop.trf.xlu0 }
 0x12c   : > { %941 = vmatmul.msk.bf16.gmra.mxu0 %vm350_vm0, %v332_v24 }
 0x133   : > { %v333_v25 = vpop.trf.xlu0 }
 0x134   : > { %949 = vmatmul.msk.bf16.gmra.mxu3 %vm350_vm0, %v333_v25 }
 0x13b   : > { %v334_v26 = vpop.trf.xlu0 }
 0x13c   : > { %942 = vmatmul.msk.bf16.vlgmr.msra.gmra.mxu1 %vm350_vm0, %v334_v26 }
 0x143   : > { %v335_v27 = vpop.trf.xlu0 }
 0x144   : > { %950 = vmatmul.msk.bf16.gmra.mxu3 %vm350_vm0, %v335_v27 }
 0x14b   : > { %v336_v28 = vpop.trf.xlu0 }
 0x14c   : > { %943 = vmatmul.msk.bf16.gmra.mxu1 %vm350_vm0, %v336_v28 }
 0x153   : > { %v337_v29 = vpop.trf.xlu0 }
 0x154   : > { %951 = vmatmul.msk.bf16.gmra.mxu3 %vm350_vm0, %v337_v29 }
 0x159   : > { %v1502_v30 = vpop.f32.mrf.mxu0 }
 0x15c   : > { %944 = vmatmul.msk.bf16.gmra.mxu1 %vm350_vm0, %v323_v15 }
 0x161   : > { %v1504_v31 = vpop.f32.mrf.mxu0 }
 0x169   : > { %v1508_v33 = vpop.f32.mrf.mxu0 }
 0x16c   : > { %945 = vmatmul.msk.bf16.gmra.mxu1 %vm350_vm0, %v325_v17 }
 0x171   : > { %v1512_v35 = vpop.f32.mrf.mxu0 }
 0x179   : > { %v1516_v37 = vpop.f32.mrf.mxu0 }
 0x17a   : > { %v488_v58 = vmax.f32 %v1502_v30, %v1516_v37 }
 0x181   : > { %v1520_v39 = vpop.f32.mrf.mxu0 }
 0x182   : > { %v489_v56 = vmax.f32 %v1504_v31, %v1520_v39 }
 0x187   : > { %v1506_v32 = vpop.f32.mrf.mxu3 }
 0x189   : > { %v1524_v41 = vpop.f32.mrf.mxu0 }
 0x18a   : > { %v490_v59 = vmax.f32 %v1508_v33, %v1524_v41 }
 0x18f   : > { %v1510_v34 = vpop.f32.mrf.mxu3 }
 0x191   : > { %v1532_v45 = vpop.f32.mrf.mxu0 }
 0x192   : > { %v491_v5 = vmax.f32 %v1512_v35, %v1532_v45 }
 0x197   : > { %v1514_v36 = vpop.f32.mrf.mxu3 }
 0x199   : > { %v1538_v48 = vpop.f32.mrf.mxu0 }
 0x19a   : > { %v492_v61 = vmax.f32 %v488_v58, %v1538_v48 }
 0x19f   : > { %v1518_v38 = vpop.f32.mrf.mxu3 }
 0x1a1   : > { %v1544_v51 = vpop.f32.mrf.mxu0 }
 0x1a2   : > { %v493_v60 = vmax.f32 %v489_v56, %v1544_v51 }
 0x1a7   : > { %v1522_v40 = vpop.f32.mrf.mxu3 }
 0x1a9   : > { %v1550_v54 = vpop.f32.mrf.mxu0 }
 0x1aa   : > { %v494_v62 = vmax.f32 %v490_v59, %v1550_v54 }
 0x1af   : > { %v1528_v43 = vpop.f32.mrf.mxu3 }
 0x1b1   : > { %v1571_v4 = vpop.f32.mrf.mxu0 }
 0x1b2   : > { %v495_v9 = vmax.f32 %v491_v5, %v1571_v4 }
 0x1b7   : > { %v1534_v46 = vpop.f32.mrf.mxu3 }
 0x1b9   : > { %v1526_v42 = vpop.f32.mrf.mxu1 }
 0x1ba   : > { %v496_v1 = vmax.f32 %v492_v61, %v1526_v42 }
 0x1bf   : > { %v1540_v49 = vpop.f32.mrf.mxu3 }
 0x1c1   : > { %v1530_v44 = vpop.f32.mrf.mxu1 }
 0x1c2   : > { %v497_v63 = vmax.f32 %v493_v60, %v1530_v44 }
 0x1c7   : > { %v1548_v53 = vpop.f32.mrf.mxu3 }
 0x1c9   : > { %v1536_v47 = vpop.f32.mrf.mxu1 }
 0x1ca   : > { %v498_v2 = vmax.f32 %v494_v62, %v1536_v47 }
 0x1cf   : > { %v1556_v57 = vpop.f32.mrf.mxu3 }
 0x1d1   : > { %v1542_v50 = vpop.f32.mrf.mxu1 }
 0x1d2   : > { %v499_v11 = vmax.f32 %v495_v9, %v1542_v50 }
 0x1d7   : > { %v1577_v8 = vpop.f32.mrf.mxu3 }
 0x1d9   : > { %v1546_v52 = vpop.f32.mrf.mxu1 }
 0x1da   : > { %v500_v6 = vmax.f32 %v496_v1, %v1546_v52 }
 0x1dc   : > { %v504_v12 = vmax.f32 %v500_v6, %v1506_v32 }
 0x1de   : > { %v508_v17 = vmax.f32 %v504_v12, %v1522_v40 }
 0x1df   : > { %v1593_v22 = vpop.f32.mrf.mxu3 }
 0x1e0   : > { %v512_v23 = vmax.f32 %v508_v17, %v1548_v53 }
 0x1e1   : > { %v1552_v55 = vpop.f32.mrf.mxu1 }
 0x1e2   : > { %v501_v3 = vmax.f32 %v497_v63, %v1552_v55 }
 0x1e4   : > { %v505_v10 = vmax.f32 %v501_v3, %v1510_v34 }
 0x1e6   : > { %v509_v15 = vmax.f32 %v505_v10, %v1528_v43 }
 0x1e8   : > { %v513_v20 = vmax.f32 %v509_v15, %v1556_v57 }
 0x1e9   : > { %v1566_v0 = vpop.f32.mrf.mxu1 }
 0x1ea   : > { %v502_v7 = vmax.f32 %v498_v2, %v1566_v0  ;;  %v516_v26 = vmax.f32 %v512_v23, %v513_v20 }
 0x1ec   : > { %v506_v13 = vmax.f32 %v502_v7, %v1514_v36 }
 0x1ee   : > { %v510_v18 = vmax.f32 %v506_v13, %v1534_v46 }
 0x1f0   : > { %v514_v24 = vmax.f32 %v510_v18, %v1577_v8 }
 0x1f1   : > { %v1584_v14 = vpop.f32.mrf.mxu1 }
 0x1f2   : > { %v503_v16 = vmax.f32 %v499_v11, %v1584_v14 }
 0x1f4   : > { %v507_v19 = vmax.f32 %v503_v16, %v1518_v38 }
 0x1f6   : > { %v511_v21 = vmax.f32 %v507_v19, %v1540_v49 }
 0x1f8   : > { %v515_v25 = vmax.f32 %v511_v21, %v1593_v22 }
 0x1fa   : > { %v517_v27 = vmax.f32 %v514_v24, %v515_v25 }
 0x1fc   : > { %v518_v28 = vmax.f32 %v516_v26, %v517_v27 }
 0x1fe   : > { %v519_v29 = vrot.slane %v518_v28, 4 }
 0x200   : > { %v520_v56 = vmax.f32 %v518_v28, %v519_v29 }
 0x202   : > { %v521_v58 = vrot.slane %v520_v56, 2 }
 0x204   : > { %v522_v59 = vmax.f32 %v520_v56, %v521_v58 }
 0x206   : > { %v523_v60 = vrot.slane %v522_v59, 1 }
 0x208   : > { %v1598_v61 = vmax.f32 %v522_v59, %v523_v60 }
 0x20a   : > { %v525_v62 = vsub.f32 %v1502_v30, %v1598_v61  ;;  %v526_v63 = vsub.f32 %v1504_v31, %v1598_v61  ;;  %v527_v1 = vsub.f32 %v1508_v33, %v1598_v61  ;;  %v528_v2 = vsub.f32 %v1512_v35, %v1598_v61 }
 0x20b   : > { %v529_v3 = vsub.f32 %v1516_v37, %v1598_v61  ;;  %v530_v7 = vsub.f32 %v1520_v39, %v1598_v61  ;;  %v531_v30 = vsub.f32 %v1524_v41, %v1598_v61  ;;  %v532_v31 = vsub.f32 %v1532_v45, %v1598_v61 }
 0x20c   : > { %v557_v5 = vmul.f32 1.442695, %v525_v62  ;;  %v559_v6 = vmul.f32 1.442695, %v526_v63  ;;  %v561_v9 = vmul.f32 1.442695, %v527_v1  ;;  %v533_v35 = vsub.f32 %v1538_v48, %v1598_v61 }
 0x20d   : > { %v563_v33 = vmul.f32 1.442695, %v528_v2  ;;  %v565_v10 = vmul.f32 1.442695, %v529_v3  ;;  %v534_v37 = vsub.f32 %v1544_v51, %v1598_v61  ;;  %v567_v11 = vmul.f32 1.442695, %v530_v7 }
 0x20e   : > { %1075 = vpow2.f32 %v557_v5  ;;  %v537_v39 = vsub.f32 %v1526_v42, %v1598_v61  ;;  %v569_v12 = vmul.f32 1.442695, %v531_v30  ;;  %v538_v41 = vsub.f32 %v1530_v44, %v1598_v61 }
 0x20f   : > { %1077 = vpow2.f32 %v559_v6  ;;  %v571_v45 = vmul.f32 1.442695, %v532_v31  ;;  %v539_v48 = vsub.f32 %v1536_v47, %v1598_v61  ;;  %v573_v15 = vmul.f32 1.442695, %v533_v35 }
 0x210   : > { %1079 = vpow2.f32 %v561_v9  ;;  %v540_v51 = vsub.f32 %v1542_v50, %v1598_v61  ;;  %v575_v42 = vmul.f32 1.442695, %v534_v37  ;;  %v541_v17 = vsub.f32 %v1546_v52, %v1598_v61 }
 0x211   : > { %1081 = vpow2.f32 %v563_v33  ;;  %v581_v44 = vmul.f32 1.442695, %v537_v39  ;;  %v542_v47 = vsub.f32 %v1552_v55, %v1598_v61  ;;  %v583_v20 = vmul.f32 1.442695, %v538_v41 }
 0x212   : > { %1083 = vpow2.f32 %v565_v10  ;;  %v585_v21 = vmul.f32 1.442695, %v539_v48  ;;  %v535_v52 = vsub.f32 %v1550_v54, %v1598_v61  ;;  %v587_v24 = vmul.f32 1.442695, %v540_v51 }
 0x213   : > { %1085 = vpow2.f32 %v567_v11  ;;  %v589_v26 = vmul.f32 1.442695, %v541_v17  ;;  %v536_v28 = vsub.f32 %v1571_v4, %v1598_v61  ;;  %v591_v29 = vmul.f32 1.442695, %v542_v47 }
 0x214   : > { %v1624_v13 = vpop.eup %1075  ;;  %1087 = vpow2.f32 %v569_v12  ;;  %v577_v59 = vmul.f32 1.442695, %v535_v52  ;;  %v555_v31 = vsub.f32 %v1577_v8, %v1598_v61  ;;  %v556_v10 = vsub.f32 %v1593_v22, %v1598_v61 }
 0x215   : > { %v1628_v16 = vpop.eup %1077  ;;  %1089 = vpow2.f32 %v571_v45  ;;  %v579_v1 = vmul.f32 1.442695, %v536_v28  ;;  %v553_v37 = vsub.f32 %v1548_v53, %v1598_v61  ;;  %v554_v41 = vsub.f32 %v1556_v57, %v1598_v61 }
 0x216   : > { %v621_v18 = vadd.f32 %v1628_v16, %v1624_v13  ;;  %v1636_v19 = vpop.eup %1079  ;;  %1091 = vpow2.f32 %v573_v15  ;;  %v543_v8 = vsub.f32 %v1566_v0, %v1598_v61  ;;  %v617_v48 = vmul.f32 1.442695, %v555_v31 }
 0x217   : > { %v1641_v23 = vpop.eup %1081  ;;  %1093 = vpow2.f32 %v575_v42  ;;  %v544_v53 = vsub.f32 %v1584_v14, %v1598_v61  ;;  %v619_v51 = vmul.f32 1.442695, %v556_v10  ;;  %v551_v42 = vsub.f32 %v1534_v46, %v1598_v61 }
 0x218   : > { %v622_v50 = vadd.f32 %v1636_v19, %v621_v18  ;;  %v1645_v25 = vpop.eup %1083  ;;  %1095 = vpow2.f32 %v581_v44  ;;  %v613_v17 = vmul.f32 1.442695, %v553_v37  ;;  %v545_v57 = vsub.f32 %v1506_v32, %v1598_v61 }
 0x219   : > { %v1648_v55 = vpop.eup %1085  ;;  %1097 = vpow2.f32 %v583_v20  ;;  %v552_v0 = vsub.f32 %v1540_v49, %v1598_v61  ;;  %v615_v18 = vmul.f32 1.442695, %v554_v41  ;;  %v593_v47 = vmul.f32 1.442695, %v543_v8 }
 0x21a   : > { %v623_v27 = vadd.f32 %v1641_v23, %v622_v50  ;;  %v1652_v56 = vpop.eup %1087  ;;  %1099 = vpow2.f32 %v585_v21  ;;  %v546_v14 = vsub.f32 %v1510_v34, %v1598_v61  ;;  %v595_v50 = vmul.f32 1.442695, %v544_v53 }
 0x21b   : > { %v1655_v58 = vpop.eup %1089  ;;  %1101 = vpow2.f32 %v587_v24  ;;  %v549_v46 = vsub.f32 %v1522_v40, %v1598_v61  ;;  %v609_v52 = vmul.f32 1.442695, %v551_v42  ;;  %v550_v32 = vsub.f32 %v1528_v43, %v1598_v61 }
 0x21c   : > { %v624_v54 = vadd.f32 %v1645_v25, %v623_v27  ;;  %v1657_v60 = vpop.eup %1091  ;;  %1103 = vpow2.f32 %v589_v26  ;;  %v611_v49 = vmul.f32 1.442695, %v552_v0  ;;  %v597_v26 = vmul.f32 1.442695, %v545_v57 }
 0x21d   : > { %v1660_v63 = vpop.eup %1093  ;;  %1105 = vpow2.f32 %v591_v29  ;;  %v547_v28 = vsub.f32 %v1514_v36, %v1598_v61  ;;  %v599_v40 = vmul.f32 1.442695, %v546_v14  ;;  %v663_v8 = vpack.c.bf16 %v1641_v23, %v1636_v19  ;;  %v956_v14 = vld [vmem:[%s1480_s7 + $0x8] sm:$0xf0] }
 0x21e   : > { %v625_v62 = vadd.f32 %v1648_v55, %v624_v54  ;;  %v1096_v4 = vpop.eup %1095  ;;  %1107 = vpow2.f32 %v577_v59  ;;  %v666_v34 = vpack.c.bf16 %v1660_v63, %v1657_v60  ;;  %v605_v54 = vmul.f32 1.442695, %v549_v46  ;;  %v984_v46 = vld [vmem:[%s1480_s7 + $0x14] sm:$0xf0] }
 0x21f   : > { %v1098_v3 = vpop.eup %1097  ;;  %1109 = vpow2.f32 %v579_v1  ;;  %v607_v1 = vmul.f32 1.442695, %v550_v32 }
 0x220   : > { %v626_v2 = vadd.f32 %v1652_v56, %v625_v62  ;;  %v1100_v5 = vpop.eup %1099  ;;  %v668_v15 = vpack.c.bf16 %v1098_v3, %v1096_v4  ;;  %1111 = vpow2.f32 %v617_v48  ;;  %v548_v62 = vsub.f32 %v1518_v38, %v1598_v61 }
 0x221   : > { %v1102_v7 = vpop.eup %1101  ;;  %1113 = vpow2.f32 %v619_v51  ;;  %v662_v51 = vpack.c.bf16 %v1628_v16, %v1624_v13 }
 0x222   : > { %v627_v6 = vadd.f32 %v1655_v58, %v626_v2  ;;  %v1664_v9 = vpop.eup %1103  ;;  %v669_v33 = vpack.c.bf16 %v1102_v7, %v1100_v5  ;;  %1115 = vpow2.f32 %v613_v17  ;;  %v603_v61 = vmul.f32 1.442695, %v548_v62 }
 0x223   : > { %v1669_v35 = vpop.eup %1105  ;;  %1117 = vpow2.f32 %v615_v18 }
 0x224   : > { %v628_v30 = vadd.f32 %v1657_v60, %v627_v6  ;;  %698 = vmatpush.bf16.msrb.mxu1 %v669_v33  ;;  %v670_v39 = vpack.c.bf16 %v1669_v35, %v1664_v9  ;;  %v1108_v12 = vpop.eup %1107  ;;  %1119 = vpow2.f32 %v593_v47  ;;  %v664_v33 = vpack.c.bf16 %v1648_v55, %v1645_v25  ;;  %v954_v25 = vld [vmem:[%s1480_s7] sm:$0xf]  ;;  %v982_v55 = vld [vmem:[%s1480_s7 + $0x4] sm:$0xf0] }
 0x225   : > { %v1110_v22 = vpop.eup %1109  ;;  %1121 = vpow2.f32 %v595_v50  ;;  %v955_v17 = vor.u32 %v982_v55, %v954_v25  ;;  %v962_v50 = vld [vmem:[%s1480_s7 + $0x10] sm:$0xf] }
 0x226   : > { %v629_v11 = vadd.f32 %v1660_v63, %v628_v30  ;;  %v667_v21 = vpack.c.bf16 %v1110_v22, %v1108_v12  ;;  %v1700_v29 = vpop.eup %1111  ;;  %1123 = vpow2.f32 %v609_v52  ;;  %v665_v63 = vpack.c.bf16 %v1655_v58, %v1652_v56 }
 0x227   : > { %v1702_v43 = vpop.eup %1113  ;;  %1125 = vpow2.f32 %v611_v49  ;;  %v963_v32 = vor.u32 %v984_v46, %v962_v50 }
 0x228   : > { %v630_v45 = vadd.f32 %v1108_v12, %v629_v11  ;;  %699 = vmatpush.bf16.msrb.mxu1 %v668_v15  ;;  %1127 = vpow2.f32 %v597_v26  ;;  %v677_v36 = vpack.c.bf16 %v1702_v43, %v1700_v29  ;;  %v983_v26 = vld [vmem:[%s1480_s7 + $0x14] sm:$0xf] }
 0x229   : > { %1129 = vpow2.f32 %v599_v40 }
 0x22a   : > { %v631_v44 = vadd.f32 %v1110_v22, %v630_v45  ;;  %1131 = vpow2.f32 %v605_v54  ;;  %717 = vmatpush.bf16.msra.mxu2 %v677_v36 }
 0x22b   : > { %1133 = vpow2.f32 %v607_v1 }
 0x22c   : > { %v632_v20 = vadd.f32 %v1096_v4, %v631_v44  ;;  %700 = vmatpush.bf16.msrb.mxu1 %v667_v21  ;;  %v1116_v4 = vpop.eup %1115 }
 0x22d   : > { %v1118_v2 = vpop.eup %1117 }
 0x22e   : > { %v633_v24 = vadd.f32 %v1098_v3, %v632_v20  ;;  %v601_v3 = vmul.f32 1.442695, %v547_v28  ;;  %v676_v31 = vpack.c.bf16 %v1118_v2, %v1116_v4  ;;  %v981_v20 = vld [vmem:[%s1480_s7 + $0x4] sm:$0xf] }
 0x230   : > { %v634_v27 = vadd.f32 %v1100_v5, %v633_v24  ;;  %701 = vmatpush.bf16.msrb.mxu1 %v666_v34  ;;  %v1120_v5 = vpop.eup %1119  ;;  %1135 = vpow2.f32 %v601_v3  ;;  %718 = vmatpush.bf16.msra.mxu2 %v676_v31  ;;  %v959_v24 = vor.u32 %v981_v20, %v956_v14 }
 0x231   : > { %v1122_v38 = vpop.eup %1121  ;;  %1137 = vpow2.f32 %v603_v61 }
 0x232   : > { %v635_v59 = vadd.f32 %v1102_v7, %v634_v27  ;;  %v1124_v7 = vpop.eup %1123  ;;  %v671_v16 = vpack.c.bf16 %v1122_v38, %v1120_v5  ;;  %v964_v27 = vld [vmem:[%s1480_s7 + $0x18] sm:$0xf0] }
 0x233   : > { %v1126_v10 = vpop.eup %1125  ;;  %v967_v34 = vor.u32 %v983_v26, %v964_v27 }
 0x234   : > { %v636_v60 = vadd.f32 %v1664_v9, %v635_v59  ;;  %702 = vmatpush.bf16.msrb.mxu1 %v665_v63  ;;  %v1128_v56 = vpop.eup %1127  ;;  %v675_v41 = vpack.c.bf16 %v1126_v10, %v1124_v7 }
 0x235   : > { %v1130_v37 = vpop.eup %1129 }
 0x236   : > { %v637_v6 = vadd.f32 %v1669_v35, %v636_v60  ;;  %v1132_v11 = vpop.eup %1131  ;;  %719 = vmatpush.bf16.msra.mxu2 %v675_v41  ;;  %v672_v18 = vpack.c.bf16 %v1130_v37, %v1128_v56 }
 0x237   : > { %v1134_v45 = vpop.eup %1133 }
 0x238   : > { %v638_v30 = vadd.f32 %v1120_v5, %v637_v6  ;;  %703 = vmatpush.bf16.msrb.mxu1 %v664_v33  ;;  %v1136_v15 = vpop.eup %1135  ;;  %v674_v53 = vpack.c.bf16 %v1134_v45, %v1132_v11 }
 0x239   : > { %v1138_v42 = vpop.eup %1137 }
 0x23a   : > { %v639_v58 = vadd.f32 %v1122_v38, %v638_v30  ;;  %720 = vmatpush.bf16.msra.mxu2 %v674_v53  ;;  %v673_v23 = vpack.c.bf16 %v1138_v42, %v1136_v15 }
 0x23c   : > { %v640_v12 = vadd.f32 %v1128_v56, %v639_v58  ;;  %704 = vmatpush.bf16.msrb.mxu1 %v663_v8 }
 0x23e   : > { %v641_v48 = vadd.f32 %v1130_v37, %v640_v12  ;;  %721 = vmatpush.bf16.msra.mxu2 %v673_v23 }
 0x240   : > { %v642_v22 = vadd.f32 %v1136_v15, %v641_v48  ;;  %705 = vmatpush.bf16.msrb.mxu1 %v662_v51 }
 0x242   : > { %v643_v44 = vadd.f32 %v1138_v42, %v642_v22  ;;  %722 = vmatpush.bf16.msra.mxu2 %v672_v18 }
 0x243   : > { %706 = vmatmul.bf16.vlgmr.msrb.gmra.mxu1 %v955_v17 }
 0x244   : > { %v644_v19 = vadd.f32 %v1132_v11, %v643_v44 }
 0x246   : > { %v645_v57 = vadd.f32 %v1134_v45, %v644_v19  ;;  %723 = vmatpush.bf16.msra.mxu2 %v671_v16 }
 0x248   : > { %v646_v0 = vadd.f32 %v1124_v7, %v645_v57 }
 0x24a   : > { %v647_v47 = vadd.f32 %v1126_v10, %v646_v0  ;;  %724 = vmatpush.bf16.msra.mxu2 %v670_v39 }
 0x24c   : > { %v648_v13 = vadd.f32 %v1116_v4, %v647_v47 }
 0x24d   : > { %725 = vmatmul.bf16.vlgmr.msra.gmra.mxu2 %v959_v24 }
 0x24e   : > { %v649_v21 = vadd.f32 %v1118_v2, %v648_v13 }
 0x250   : > { %v650_v52 = vadd.f32 %v1700_v29, %v649_v21 }
 0x252   : > { %v651_v49 = vadd.f32 %v1702_v43, %v650_v52 }
 0x253   : > { %711 = vmatmul.bf16.gmra.mxu1 %v963_v32 }
 0x254   : > { %v652_v28 = vrot.slane %v651_v49, 4 }
 0x256   : > { %v653_v40 = vadd.f32 %v652_v28, %v651_v49 }
 0x258   : > { %v654_v54 = vrot.slane %v653_v40, 2 }
 0x25a   : > { %v655_v59 = vadd.f32 %v654_v54, %v653_v40 }
 0x25c   : > { %v656_v62 = vrot.slane %v655_v59, 1 }
 0x25d   : > { %730 = vmatmul.bf16.gmra.mxu2 %v967_v34 }
 0x25e   : > { %v657_v29 = vadd.f32 %v656_v62, %v655_v59 }
 0x260   : > { %1139 = vrcp.f32 %v657_v29  ;;  %v747_v43 = vand.u32 2147483648, %v657_v29  ;;  %vm741_vm2 = vweird.f32 %v657_v29  ;;  %v745_v36 = vand.u32 2147483647, %v657_v29 }
 0x262   : > { %v748_v3 = vor.u32 1.1754944e-38, %v747_v43  ;;  %vm746_vm4 = vcmp.eq.f32.partialorder %v745_v36, 8.507059e+37 }
 0x266   : > { %v1140_v1 = vpop.eup %1139 }
 0x267   : > { %v737_v4 = vmul.f32 %v1140_v1, %v657_v29  ;;  %vm742_vm1 = vweird.f32 %v1140_v1 }
 0x268   : > { %vm743_vm3 = vmor %vm741_vm2, %vm742_vm1 }
 0x269   : > { %v738_v60 = vsub.f32 1.0, %v737_v4 }
 0x26b   : > { %v739_v9 = vmul.f32 %v1140_v1, %v738_v60 }
 0x26d   : > { %v740_v39 = vadd.f32 %v1140_v1, %v739_v9 }
 0x26f   : > { %v744_v63 = vsel %vm743_vm3, %v1140_v1, %v740_v39 }
 0x270   : > { %v749_v6 = vsel %vm746_vm4, %v748_v3, %v744_v63 }
 0x2c0   : > { %v707_v35 = vpop.f32.mrf.mxu1 }
 0x2c8   : > { %v709_v61 = vpop.f32.mrf.mxu1 }
 0x2d0   : > { %v726_v2 = vpop.f32.mrf.mxu2  ;;  %v712_v33 = vpop.f32.mrf.mxu1 }
 0x2d1   : > { %v727_v5 = vadd.f32 %v726_v2, %v707_v35 }
 0x2d3   : > { %v750_v38 = vmul.f32 %v749_v6, %v727_v5 }
 0x2d5   : > { %754 = vst [vmem:[%s282_s8] sm:$0xff] %v750_v38 }
 0x2d8   : > { %v728_v7 = vpop.f32.mrf.mxu2  ;;  %v714_v37 = vpop.f32.mrf.mxu1 }
 0x2d9   : > { %v729_v30 = vadd.f32 %v728_v7, %v709_v61 }
 0x2db   : > { %v751_v31 = vmul.f32 %v749_v6, %v729_v30 }
 0x2dd   : > { %755 = vst [vmem:[%s282_s8 + $0x8] sm:$0xff] %v751_v31 }
 0x2e0   : > { %v731_v10 = vpop.f32.mrf.mxu2 }
 0x2e1   : > { %v732_v56 = vadd.f32 %v731_v10, %v712_v33 }
 0x2e3   : > { %v752_v58 = vmul.f32 %v749_v6, %v732_v56 }
 0x2e5   : > { %756 = vst [vmem:[%s282_s8 + $0x10] sm:$0xff] %v752_v58 }
 0x2e8   : > { %v733_v11 = vpop.f32.mrf.mxu2 }
 0x2e9   : > { %v734_v12 = vadd.f32 %v733_v11, %v714_v37 }
 0x2eb   : > { %v753_v41 = vmul.f32 %v749_v6, %v734_v12 }
 0x2ed   : > { %757 = vst [vmem:[%s282_s8 + $0x18] sm:$0xff] %v753_v41 }
 0x2ee   : > { %1258 = shalt.err (!%p1255_p13)
}
 0x2ef   : > { %s1328_s27 = smov 128   ;;  %s1329_s6 = smov 8  }
 0x2f0   : > { %998 = dma.vmem_to_hbm [thread:$0]  (%p1444_p0), %s773_s24, 512, %s775_s4, %s759_s5, %s1328_s27, %s1328_s27, %s1329_s6  }
 0x2f1 PF: > { %s789_s7 = sand.u32 1, %s1301_s12   ;;  %p1012_p4 = pnand %p900_p3, %p1448_p2 }
 0x2f2   : > { %s790_s8 = scalar_lea.sflag [#allocation4], %s789_s7 }
 0x2f3   : > { %p1013_p5 = pneg %p1012_p4 }
 0x2f5   : > { %1296 = dma.done.wait (%p1013_p5), %s790_s8, 512  }
 0x2f6   : > { %1298 = vsyncadd (%p1013_p5), %s790_s8, 4294966784  ;;  %s20_s17 = sadd.s32 1, %s1321_s17   ;;  %s1780_s12 = smov %s1305_s13 }
 0x2f7   : > { %p17_p6 = scmp.ge.s32.totalorder %s20_s17, 4   ;;  %s1781_s13 = smov %s1309_s14 }
 0x2f8   : > { %s1782_s14 = smov %s1402_s25  ;;  %s1783_s15 = smov %s1317_s16 }
 0x2f9   : > { %s1784_s16 = smov %s1786_s18  ;;  %19 = sbr.rel (!%p17_p6) target bundleno = 7 (0x7), region = 93 }
 0x2fe   :  { %796 = vsyncpa [#allocation3], 1 }
 0x2ff   :  { %798 = vsyncpa [#allocation3 + $0x1], 1 }
 0x300   :  { %799 = vsyncpa [#allocation6], 1 }
 0x301   :  { %800 = vsyncpa [#allocation4], 1 }
 0x302   :  { %802 = vsyncpa [#allocation4 + $0x1], 1 }

</bundles_post_ra>
